<compile_context>
chip_gen: v6e
topology: v6e:2x2x1
jax: 0.10.0
libtpu: 0.0.40
codegen_flags: <defaults>
</compile_context>

<pallas_src>
import functools
import itertools

import numpy as np
import jax
import jax.numpy as jnp
from jax.experimental import pallas as pl
from jax.experimental.pallas import tpu as pltpu


# --------------------------------------------------------------------------- helpers
def _round_up(x, m):
    return (x + m - 1) // m * m


def _vmem_limit_bytes():
    # Generation-aware scoped-VMEM budget.
    try:
        cap = int(getattr(pltpu.get_tpu_info(), "vmem_capacity_bytes", 64 * 1024 * 1024))
    except Exception:
        cap = 64 * 1024 * 1024
    return int(min(cap * 3 // 4, 96 * 1024 * 1024))


_VMEM_LIMIT = _vmem_limit_bytes()


def _pick_tm(M, max_tm=512):
    """M tile: multiple of 16 (bf16 vreg packing), >= 2 blocks when M allows it
    (keeps both v7x TensorCores busy), preferring divisors of M (no pad copy of A)."""
    if M <= 16:
        return _round_up(max(M, 8), 8)
    cap = min(max_tm, _round_up(M // 2, 16))
    for tm in range(cap, 15, -16):
        if M % tm == 0:
            return tm
    return cap


# --------------------------------------------- fused weight-resident matmul (1 K step)
def _make_mm_kernel(relu, has_res):
    if has_res:
        def kernel(a_ref, b_ref, c_ref, r_ref, o_ref):
            y = jnp.dot(a_ref[...], b_ref[...], preferred_element_type=jnp.float32)
            y = y + c_ref[...] + r_ref[...].astype(jnp.float32)
            if relu:
                y = jnp.maximum(y, 0.0)
            o_ref[...] = y.astype(o_ref.dtype)
    else:
        def kernel(a_ref, b_ref, c_ref, o_ref):
            y = jnp.dot(a_ref[...], b_ref[...], preferred_element_type=jnp.float32)
            y = y + c_ref[...]
            if relu:
                y = jnp.maximum(y, 0.0)
            o_ref[...] = y.astype(o_ref.dtype)
    return kernel


@functools.lru_cache(maxsize=None)
def _get_matmul(Mp, Kp, Np, tm, relu, has_res, out_dtype):
    kernel = _make_mm_kernel(relu, has_res)
    a_spec = pl.BlockSpec((tm, Kp), lambda i: (i, 0))
    if Mp // tm >= 4:
        # With the weight resident, A is the only exposed DMA stream: deepen its
        # pipelining on long-M grids (stem / layer1 at realistic input sizes).
        try:
            a_spec = pl.BlockSpec((tm, Kp), lambda i: (i, 0),
                                  pipeline_mode=pl.Buffered(3))
        except TypeError:  # older BlockSpec signature
            a_spec = pl.BlockSpec((tm, Kp), lambda i: (i, 0))
    in_specs = [
        a_spec,
        pl.BlockSpec((Kp, Np), lambda i: (0, 0)),   # whole weight, VMEM-resident
        pl.BlockSpec((1, Np), lambda i: (0, 0)),    # folded-BN bias
    ]
    if has_res:
        in_specs.append(pl.BlockSpec((tm, Np), lambda i: (i, 0)))
    return pl.pallas_call(
        kernel,
        out_shape=jax.ShapeDtypeStruct((Mp, Np), out_dtype),
        grid_spec=pltpu.PrefetchScalarGridSpec(
            num_scalar_prefetch=0,
            grid=(Mp // tm,),
            in_specs=in_specs,
            out_specs=pl.BlockSpec((tm, Np), lambda i: (i, 0)),
        ),
        compiler_params=pltpu.CompilerParams(
            dimension_semantics=("parallel",),
            vmem_limit_bytes=_VMEM_LIMIT),
    )


def matmul_bias(a, w2d, bias, residual=None, relu=False, out_dtype=jnp.bfloat16):
    """relu?((a @ w2d) + bias [+ residual]) with the full (Kp, Np) bf16 weight held
    in VMEM (single K step, no accumulator revisits).  Padded columns stay zero."""
    M, K = a.shape
    Kp, Np = w2d.shape
    a = a.astype(jnp.bfloat16)
    tm = _pick_tm(M)
    Mp = _round_up(M, tm)
    if Mp != M or Kp != K:
        a = jnp.pad(a, ((0, Mp - M), (0, Kp - K)))
    args = [a, w2d, bias]
    has_res = residual is not None
    if has_res:
        r = residual.astype(jnp.bfloat16)
        if Mp != M:
            r = jnp.pad(r, ((0, Mp - M), (0, 0)))
        args.append(r)
    out = _get_matmul(Mp, Kp, Np, tm, bool(relu), has_res, out_dtype)(*args)
    return out[:M] if Mp != M else out


# ----------------------------------------- direct 3x3 / stride-1 conv (no im2col HBM)
@functools.lru_cache(maxsize=None)
def _get_conv3x3(N, H, W, Cs, Cout, relu):
    Wp = W + 2            # pad-1 columns
    Hp = H + 3            # pad-1 rows + one extra bottom row so the flattened
                          # per-tap windows never index out of the buffer
    Mrows = H * Wp        # outputs computed over the padded width; the 2 garbage
                          # columns per row are dropped in VMEM before the store

    def kernel(x_ref, w_ref, b_ref, o_ref, acc_ref):
        for t in range(9):
            kh, kw = divmod(t, 3)
            a = x_ref[0, pl.ds(kh * Wp + kw, Mrows), :]
            contrib = jnp.dot(a, w_ref[t], preferred_element_type=jnp.float32)
            if t == 0:
                acc_ref[...] = contrib
            else:
                acc_ref[...] += contrib
        y = acc_ref[...] + b_ref[...]
        if relu:
            y = jnp.maximum(y, 0.0)
        y = y.reshape(H, Wp, Cout)[:, :W, :]      # drop garbage columns in VMEM
        o_ref[0] = y.astype(o_ref.dtype)

    return pl.pallas_call(
        kernel,
        out_shape=jax.ShapeDtypeStruct((N, H, W, Cout), jnp.bfloat16),
        grid_spec=pltpu.PrefetchScalarGridSpec(
            num_scalar_prefetch=0,
            grid=(N,),
            in_specs=[
                pl.BlockSpec((1, Hp * Wp, Cs), lambda n: (n, 0, 0)),
                pl.BlockSpec((9, Cs, Cout), lambda n: (0, 0, 0)),   # resident taps
                pl.BlockSpec((1, Cout), lambda n: (0, 0)),
            ],
            out_specs=pl.BlockSpec((1, H, W, Cout), lambda n: (n, 0, 0, 0)),
            scratch_shapes=[pltpu.VMEM((Mrows, Cout), jnp.float32)],
        ),
        compiler_params=pltpu.CompilerParams(
            dimension_semantics=("parallel",),
            vmem_limit_bytes=_VMEM_LIMIT),
    )


def conv3x3_direct(x, p, relu=True):
    """3x3 / stride-1 / pad-1 conv + folded-BN bias + ReLU computed directly from the
    padded NHWC activation: 9 taps accumulated in-kernel from constant-shift windows
    of the flattened rows (no (N,Ho,Wo,9*Cin) patch tensor in HBM)."""
    # TODO(synk): very large spatial extents would need row tiling with a halo; all
    #             standard ResNet feature maps fit a per-image block in VMEM.
    N, H, W, Cs = x.shape
    Cout = p["w9"].shape[-1]
    xp = jnp.pad(x, ((0, 0), (1, 2), (1, 1), (0, 0)))
    xf = xp.reshape(N, (H + 3) * (W + 2), Cs)
    return _get_conv3x3(N, H, W, Cs, Cout, bool(relu))(xf, p["w9"], p["bias"])


# --------------------------------------------------- im2col path (stem + stride-2 3x3)
def conv_im2col(x, p, relu=True):
    """7x7/2 stem and the three stride-2 3x3 convs: im2col (plain-JAX slicing glue) +
    the weight-resident fused matmul.  Their patch tensors are small (stride-2
    output spatial); the stride-1 3x3s use the direct kernel instead."""
    kh, kw, stride, pad = p["kh"], p["kw"], p["stride"], p["pad"]
    N, H, W, Cs = x.shape
    Ho = (H + 2 * pad - kh) // stride + 1
    Wo = (W + 2 * pad - kw) // stride + 1
    if pad:
        x = jnp.pad(x, ((0, 0), (pad, pad), (pad, pad), (0, 0)))
    cols = [x[:, i:i + stride * (Ho - 1) + 1:stride,
              j:j + stride * (Wo - 1) + 1:stride, :]
            for i in range(kh) for j in range(kw)]
    patches = jnp.concatenate(cols, axis=-1)
    a = patches.reshape(N * Ho * Wo, kh * kw * Cs)
    Np = p["w2d"].shape[1]
    y = matmul_bias(a, p["w2d"], p["bias"], relu=relu)
    return y.reshape(N, Ho, Wo, Np)


def conv1x1(x, p, stride=1, relu=False):
    if stride != 1:
        x = x[:, ::stride, ::stride, :]
    N, H, W, Cs = x.shape
    Np = p["w2d"].shape[1]
    y = matmul_bias(x.reshape(N * H * W, Cs), p["w2d"], p["bias"], relu=relu)
    return y.reshape(N, H, W, Np)


# ------------------------------------------------------------------ max-pool (direct)
@functools.lru_cache(maxsize=None)
def _get_maxpool(N, H, W, C):
    Hp, Wp = H + 2, W + 2
    Ho, Wo = H // 2, W // 2

    def kernel(x_ref, o_ref):
        x = x_ref[0]                                     # (Hp, Wp, C)
        # Column pairs regrouped onto the lane axis -> only 128-aligned lane slices
        # and unit-stride sublane slices (no strided / parity relayouts).
        xg = x.reshape(Hp, Wp // 2, 2 * C)
        ev, od = xg[:, :, :C], xg[:, :, C:]              # even / odd padded columns
        h = jnp.maximum(jnp.maximum(ev[:, :Wo, :], od[:, :Wo, :]), ev[:, 1:Wo + 1, :])
        hg = h.reshape(Hp // 2, 2, Wo, C)                # row pairs on an outer dim
        rev, rod = hg[:, 0], hg[:, 1]
        o_ref[0] = jnp.maximum(jnp.maximum(rev[:Ho], rod[:Ho]), rev[1:Ho + 1])

    return pl.pallas_call(
        kernel,
        out_shape=jax.ShapeDtypeStruct((N, Ho, Wo, C), jnp.bfloat16),
        grid_spec=pltpu.PrefetchScalarGridSpec(
            num_scalar_prefetch=0,
            grid=(N,),
            in_specs=[pl.BlockSpec((1, Hp, Wp, C), lambda n: (n, 0, 0, 0))],
            out_specs=pl.BlockSpec((1, Ho, Wo, C), lambda n: (n, 0, 0, 0)),
        ),
        compiler_params=pltpu.CompilerParams(
            dimension_semantics=("parallel",),
            vmem_limit_bytes=_VMEM_LIMIT),
    )


def maxpool2d_3x3_s2_p1(x):
    N, H, W, C = x.shape
    # zero spatial padding is exact here: the input is post-ReLU (>= 0).
    # TODO(synk): odd H/W would need the general output-size arithmetic; the standard
    #             ResNet stem always reaches this pool with even spatial dims.
    assert H % 2 == 0 and W % 2 == 0, (H, W)
    xp = jnp.pad(x, ((0, 0), (1, 1), (1, 1), (0, 0)))
    return _get_maxpool(N, H, W, C)(xp)


# ------------------------------------------------------- global avg-pool fused into FC
@functools.lru_cache(maxsize=None)
def _get_avgpool_fc(Npad, HW, C, Ncls_p):
    def kernel(x_ref, w_ref, b_ref, o_ref):
        feat = jnp.mean(x_ref[...].astype(jnp.float32), axis=1)        # (Npad, C)
        y = jnp.dot(feat.astype(jnp.bfloat16), w_ref[...],
                    preferred_element_type=jnp.float32) + b_ref[...]
        o_ref[...] = y

    return pl.pallas_call(
        kernel,
        out_shape=jax.ShapeDtypeStruct((Npad, Ncls_p), jnp.float32),
        grid_spec=pltpu.PrefetchScalarGridSpec(
            num_scalar_prefetch=0,
            grid=(1,),
            in_specs=[pl.BlockSpec((Npad, HW, C), lambda i: (0, 0, 0)),
                      pl.BlockSpec((C, Ncls_p), lambda i: (0, 0)),
                      pl.BlockSpec((1, Ncls_p), lambda i: (0, 0))],
            out_specs=pl.BlockSpec((Npad, Ncls_p), lambda i: (0, 0)),
        ),
        compiler_params=pltpu.CompilerParams(
            dimension_semantics=("arbitrary",),
            vmem_limit_bytes=_VMEM_LIMIT),
    )


def avgpool_fc(x, fc):
    """AdaptiveAvgPool2d((1,1)) + flatten + Linear fused into one kernel (no (N,2048)
    feature round-trip through HBM)."""
    N, H, W, C = x.shape
    xr = x.reshape(N, H * W, C)
    Npad = _round_up(N, 8)
    if Npad != N:
        xr = jnp.pad(xr, ((0, Npad - N), (0, 0), (0, 0)))
    out = _get_avgpool_fc(Npad, H * W, C, fc["w2d"].shape[1])(xr, fc["w2d"], fc["bias"])
    return out[:N, :fc["n"]]


# ------------------------------------------------------------------- parameter setup
_KEY = jax.random.PRNGKey(0)
_counter = itertools.count()
_BN_EPS = 1e-5
# eval-mode BatchNorm with identity running stats (gamma=1, beta=0, mean=0, var=1);
# its scale is folded into the conv weights, leaving only a (zero) bias stream.
# Padded weight rows / columns and bias tails are exactly zero so padded channels
# stay zero through the whole network.
_BN_SCALE = float(1.0 / np.sqrt(1.0 + _BN_EPS))


def conv_bn_params(kh, kw, cin, cout, *, stride=1, cin_storage=None):
    key = jax.random.fold_in(_KEY, next(_counter))
    if cin_storage is None:
        cin_storage = _round_up(cin, 128)          # channels the activation carries
    cout_p = _round_up(cout, 128)
    fan_in = kh * kw * cin
    w = jax.random.normal(key, (kh, kw, cin, cout), jnp.float32) * np.sqrt(2.0 / fan_in)
    w = np.asarray(w) * _BN_SCALE                  # fold BN scale into the weights
    p = {"kh": kh, "kw": kw, "stride": stride, "pad": (kh - 1) // 2,
         "bias": jnp.zeros((1, cout_p), jnp.float32)}
    if kh == 3 and kw == 3 and stride == 1:
        w9 = np.zeros((9, cin_storage, cout_p), np.float32)
        w9[:, :cin, :cout] = w.reshape(9, cin, cout)
        p["w9"] = jnp.asarray(w9, jnp.bfloat16)
    else:
        # tap-major / channel-minor 2-D weight matching the im2col / 1x1 layout
        K = kh * kw * cin_storage
        Kp = _round_up(K, 128)
        w2d = np.zeros((Kp, cout_p), np.float32)
        for t in range(kh * kw):
            i, j = divmod(t, kw)
            w2d[t * cin_storage:t * cin_storage + cin, :cout] = w[i, j]
        p["w2d"] = jnp.asarray(w2d, jnp.bfloat16)
    return p


def make_layer(inplanes, planes, blocks, stride):
    layer = []
    for b in range(blocks):
        s = stride if b == 0 else 1
        need_ds = (b == 0) and (s != 1 or inplanes != planes * 4)
        blk = {
            "conv1": conv_bn_params(1, 1, inplanes, planes),
            "conv2": conv_bn_params(3, 3, planes, planes, stride=s),
            "conv3": conv_bn_params(1, 1, planes, planes * 4),
            "downsample": (conv_bn_params(1, 1, inplanes, planes * 4)
                           if need_ds else None),
            "stride": s,
        }
        layer.append(blk)
        inplanes = planes * 4
    return layer, inplanes


def init_resnet101_params(num_classes=6):
    params = {"conv1": conv_bn_params(7, 7, 3, 64, stride=2, cin_storage=3)}
    inplanes = 64
    params["layer1"], inplanes = make_layer(inplanes, 64, 3, 1)    # 3 bottlenecks
    params["layer2"], inplanes = make_layer(inplanes, 128, 4, 2)   # 4 bottlenecks
    params["layer3"], inplanes = make_layer(inplanes, 256, 23, 2)  # 23 bottlenecks
    params["layer4"], inplanes = make_layer(inplanes, 512, 3, 2)   # 3 bottlenecks

    k = jax.random.fold_in(_KEY, next(_counter))
    kw_, kb_ = jax.random.split(k)
    bound = 1.0 / np.sqrt(inplanes)
    fc_w = jax.random.uniform(kw_, (inplanes, num_classes), jnp.float32, -bound, bound)
    fc_b = jax.random.uniform(kb_, (num_classes,), jnp.float32, -bound, bound)
    Np = _round_up(num_classes, 128)
    params["fc"] = {
        "w2d": jnp.pad(fc_w.astype(jnp.bfloat16), ((0, 0), (0, Np - num_classes))),
        "bias": jnp.pad(fc_b.reshape(1, num_classes), ((0, 0), (0, Np - num_classes))),
        "n": num_classes,
    }
    return params


# -------------------------------------------------------------------- forward pass
def bottleneck_forward(x, blk):
    s = blk["stride"]
    identity = x
    out = conv1x1(x, blk["conv1"], relu=True)
    if s == 1:
        out = conv3x3_direct(out, blk["conv2"], relu=True)
    else:
        out = conv_im2col(out, blk["conv2"], relu=True)    # only 3 stride-2 3x3 convs
    if blk["downsample"] is not None:
        identity = conv1x1(x, blk["downsample"], stride=s, relu=False)
    # conv3 (1x1) with the residual add + final ReLU fused into the matmul epilogue
    N, H, W, Cs = out.shape
    Np = blk["conv3"]["w2d"].shape[1]
    y = matmul_bias(out.reshape(N * H * W, Cs), blk["conv3"]["w2d"],
                    blk["conv3"]["bias"],
                    residual=identity.reshape(N * H * W, Np), relu=True)
    return y.reshape(N, H, W, Np)


def resnet101_forward(params, x_nchw):
    # NCHW (PyTorch convention) -> NHWC once; bf16 activations, padded channel axis.
    x = jnp.transpose(x_nchw, (0, 2, 3, 1)).astype(jnp.bfloat16)
    x = conv_im2col(x, params["conv1"], relu=True)          # 7x7 / stride-2 stem
    x = maxpool2d_3x3_s2_p1(x)
    for name in ("layer1", "layer2", "layer3", "layer4"):
        for blk in params[name]:
            x = bottleneck_forward(x, blk)
    return avgpool_fc(x, params["fc"])                      # (N, num_classes) f32


# ------------------------------------------------------------------------------ main
if __name__ == "__main__":
    key = jax.random.PRNGKey(0)
    # NCHW, 3 channels; 32x32 keeps the example small while still producing a valid
    # 1x1 feature map before the global average pool.
    x = jax.random.normal(key, (2, 3, 32, 32), jnp.float32)

    params = init_resnet101_params(num_classes=6)
    logits = resnet101_forward(params, x)
    logits = jax.block_until_ready(logits)

    assert logits.shape == (2, 6), logits.shape
    assert bool(jnp.all(jnp.isfinite(logits)))
    print("KERNEL_OK")
</pallas_src>

<mosaic_0001>
module attributes {stable_mosaic.version = 11 : i64} {
  func.func @kernel(%arg0: i32, %arg1: memref<256x256xbf16, #tpu.memory_space<vmem>>, %arg2: memref<256x128xbf16, #tpu.memory_space<vmem>>, %arg3: memref<1x128xf32, #tpu.memory_space<vmem>>, %arg4: memref<256x128xbf16, #tpu.memory_space<vmem>>) attributes {dimension_semantics = [#tpu.dimension_semantics<parallel>], iteration_bounds = array<i64: 2>, scalar_prefetch = 0 : i64, scratch_operands = 0 : i64, tpu.core_type = #tpu.core_type<tc>, window_params = [{transform_indices = @transform_0, window_bounds = array<i64: 256, 256>}, {pipeline_mode = #tpu.pipeline_mode<synchronous>, transform_indices = @transform_1, window_bounds = array<i64: 256, 128>}, {pipeline_mode = #tpu.pipeline_mode<synchronous>, transform_indices = @transform_2, window_bounds = array<i64: 1, 128>}, {transform_indices = @transform_3, window_bounds = array<i64: 256, 128>}]} {
    %c0 = arith.constant 0 : index
    %c0_0 = arith.constant 0 : index
    %0 = vector.load %arg1[%c0, %c0_0] : memref<256x256xbf16, #tpu.memory_space<vmem>>, vector<256x256xbf16>
    %c0_1 = arith.constant 0 : index
    %c0_2 = arith.constant 0 : index
    %1 = vector.load %arg2[%c0_1, %c0_2] : memref<256x128xbf16, #tpu.memory_space<vmem>>, vector<256x128xbf16>
    %cst = arith.constant dense<0.000000e+00> : vector<256x128xf32>
    %2 = tpu.matmul %0, %1, %cst {dimension_numbers = #tpu.dot_dimension_numbers<[1], [0], [0], [1], [0, 0, 1, 1], [], []>} : vector<256x256xbf16>, vector<256x128xbf16>, vector<256x128xf32> -> vector<256x128xf32>
    %c0_3 = arith.constant 0 : index
    %c0_4 = arith.constant 0 : index
    %3 = vector.load %arg3[%c0_3, %c0_4] : memref<1x128xf32, #tpu.memory_space<vmem>>, vector<1x128xf32>
    %4 = vector.broadcast %3 : vector<1x128xf32> to vector<256x128xf32>
    %5 = arith.addf %2, %4 : vector<256x128xf32>
    %cst_5 = arith.constant 0.000000e+00 : f32
    %6 = vector.broadcast %cst_5 : f32 to vector<256x128xf32>
    %7 = arith.maximumf %5, %6 : vector<256x128xf32>
    %8 = arith.truncf %7 : vector<256x128xf32> to vector<256x128xbf16>
    %c0_6 = arith.constant 0 : index
    %c0_7 = arith.constant 0 : index
    %9 = vector.load %arg4[%c0_6, %c0_7] : memref<256x128xbf16, #tpu.memory_space<vmem>>, vector<256x128xbf16>
    tpu.vector_store %arg4[%c0_6, %c0_7], %8 {strides = array<i32>} : memref<256x128xbf16, #tpu.memory_space<vmem>>, vector<256x128xbf16>,
    return
  }
  func.func @transform_0(%arg0: i32) -> (i32, i32) {
    %c0_i32 = arith.constant 0 : i32
    %c0_i32_0 = arith.constant 0 : i32
    return %arg0, %c0_i32 : i32, i32
  }
  func.func @transform_1(%arg0: i32) -> (i32, i32) {
    %c0_i32 = arith.constant 0 : i32
    %c0_i32_0 = arith.constant 0 : i32
    %c0_i32_1 = arith.constant 0 : i32
    return %c0_i32, %c0_i32_0 : i32, i32
  }
  func.func @transform_2(%arg0: i32) -> (i32, i32) {
    %c0_i32 = arith.constant 0 : i32
    %c0_i32_0 = arith.constant 0 : i32
    %c0_i32_1 = arith.constant 0 : i32
    return %c0_i32, %c0_i32_0 : i32, i32
  }
  func.func @transform_3(%arg0: i32) -> (i32, i32) {
    %c0_i32 = arith.constant 0 : i32
    %c0_i32_0 = arith.constant 0 : i32
    return %arg0, %c0_i32 : i32, i32
  }
}

</mosaic_0001>

<bundles_post_ra>
// kernel: tpu_custom_call.1
= control target key start
LH: loop header
LB: loop body
LE: loop exit
PB: predicated region body
PF: predicated region fallthrough
CT: control target
= control target key end

     0   :  { %8 = vsyncpa [#allocation3], 0  ;;  %s1889_s0 = inlined_call_operand.hbm [shape: bf16[512,256], index: 0, kind: input, shape index: {}]   ;;  %s1890_s1 = inlined_call_operand.hbm [shape: bf16[256,128], index: 1, kind: input, shape index: {}]   ;;  %s1891_s2 = inlined_call_operand.vmem [shape: f32[1,128], index: 2, kind: input, shape index: {}]   ;;  %s1892_s3 = inlined_call_operand.hbm [shape: bf16[512,128], index: 3, kind: output, shape index: {}]  }
   0x1   :  { %10 = vsyncpa [#allocation3 + $0x1], 0 }
   0x2   :  { %11 = vsyncpa [#allocation6], 0 }
   0x3   :  { %12 = vsyncpa [#allocation4], 0 }
   0x4   :  { %14 = vsyncpa [#allocation4 + $0x1], 0  ;;  %s1621_s12 = smov 0   ;;  %s1623_s13 = smov 0  }
   0x5   :  { %s1625_s14 = smov 0   ;;  %s1627_s15 = smov 0  }
   0x6 LB: > { %s1642_s16 = sadd.s32 4294967295, %s1590_s15   ;;  %s985_s17 = sadd.s32 4294967294, %s1590_s15   ;;  %s1590_s15 = sphi %s1627_s15, %s1914_s15   ;;  %s1586_s14 = sphi %s1625_s14, %s1913_s14   ;;  %s1582_s13 = sphi %s1623_s13, %s1912_s13   ;;  %s1578_s12 = sphi %s1621_s12, %s1911_s12  }
   0x7   : > { %p40_p0 = scmp.ne.s32.totalorder %s1582_s13, %s1578_s12  ;;  %p1893_p1 = scmp.eq.s32.totalorder %s1642_s16, 0 }
   0x8   : > { %p112_p3 = scmp.eq.s32.totalorder %s985_s17, 1  ;;  %p986_p5 = scmp.ge.s32.totalorder %s1590_s15, 1 }
   0x9   : > { %p1651_p4 = por %p1893_p1, %p40_p0  ;;  %p119_p7 = scmp.lt.s32.totalorder %s1590_s15, 3 }
   0xa   : > { %p1656_p6 = por %p112_p3, %p40_p0  ;;  %s1592_s21 = smov [#allocation5]  }
   0xb   : > { %s1897_s18 = scalar_select %p1651_p4, 1, 0 }
   0xc   : > { %s1898_s19 = scalar_select %p1656_p6, 1, 0 }
   0xd   : > { %p1661_p8 = pnand %p986_p5, %p119_p7  ;;  %s131_s22 = sshll.u32 %s1592_s21, 4  ;;  %s132_s22 = int_to_ptr.vmem [resolvable:$true] %s131_s22 }
   0xe   : > { %s1675_s24 = sadd.s32 1, %s1590_s15   ;;  %s27_s25 = sadd.s32 1, %s1586_s14 }
   0xf   : > { %s1899_s20 = scalar_select %p1661_p8, 1, 0 }
  0x10   : > { %p1349_p9 = pneg %p1661_p8  ;;  %s24_s26 = ssub.s32 %s1590_s15, %s1675_s24 }
  0x11   : > { %s1479_s27 = scalar_lea.vmem %s132_s22, 2048  ;;  %p1487_p5 = scmp.lt.s32.totalorder %s132_s22, %s132_s22 }
  0x12   : > { %p1670_p11 = pnand %p1349_p9, %p1893_p1  ;;  %p1480_p13 = scmp.ne.s32.totalorder %s132_s22, %s1479_s27 }
  0x13   : > { %p1488_p7 = scmp.lt.s32.totalorder %s1479_s27, %s1479_s27 }
  0x14   : > { %p1470_p12 = pneg %p1670_p11 }
  0x15   : > { %p1489_p10 = por %p1488_p7, %p1487_p5 }
  0x16   : > { %p1482_p0 = pnand %p1480_p13, %p1470_p12 }
  0x18   : > { %p1483_p3 = pneg %p1482_p0 }
  0x1a   : > { %p1490_p2 = pnand %p1489_p10, %p1483_p3 }
  0x1c   : > { %1493 = shalt.err (!%p1490_p2)
}
  0x1d   : > { %s1593_s28 = smov 64   ;;  %s1594_s29 = smov 4  }
  0x1e   : > { %1352 = dma.hbm_to_vmem [thread:$0]  (!%p1670_p11), %s1890_s1, 2048, %s132_s22, [#allocation6], %s1593_s28, %s1593_s28, %s1594_s29  }
  0x1f   : > { %p25_p9 = scmp.eq.s32.totalorder %s24_s26, 0  ;;  %p34_p12 = scmp.ne.s32.totalorder %s1586_s14, %s1582_s13 }
  0x20   : > { %p35_p10 = scmp.eq.s32.totalorder %s1590_s15, 0  ;;  %p1362_p2 = scmp.lt.s32.totalorder %s1590_s15, 2 }
  0x21   : > { %s1692_s5 = scalar_select %p25_p9, %s1586_s14, %s27_s25  }
  0x22   : > { %p36_p13 = por %p35_p10, %p34_p12  ;;  %p1901_p0 = scmp.eq.s32.totalorder %s1642_s16, 1 }
  0x23   : > { %s148_s7 = sand.u32 1, %s1586_s14   ;;  %s1084_s8 = sshll.u32 %s1590_s15, 12 }
  0x24   : > { %p1696_p3 = por %p1901_p0, %p34_p12  ;;  %s989_s9 = sshll.u32 %s148_s7, 8 }
  0x25   : > { %s1705_s17 = scalar_lea.hbm %s1889_s0, %s1084_s8  ;;  %s152_s21 = scalar_lea.vmem [#allocation2], %s989_s9 }
  0x26   : > { %s1902_s6 = scalar_select %p1696_p3, 1, 0 }
  0x27   : > { %s160_s22 = sshll.u32 %s152_s21, 4  ;;  %p1707_p11 = pnand %p1362_p2, %p36_p13  ;;  %s1711_s22 = int_to_ptr.vmem [resolvable:$true] %s160_s22 }
  0x28   : > { %s1713_s25 = scalar_lea.sflag [#allocation3], %s148_s7  ;;  %s1494_s26 = scalar_lea.hbm %s1705_s17, 4096 }
  0x29   : > { %p1495_p5 = scmp.ne.s32.totalorder %s1705_s17, %s1494_s26  ;;  %p1496_p7 = pneg %p1707_p11 }
  0x2a   : > { %s1499_s29 = scalar_lea.hbm %s1889_s0, 8192  ;;  %p1500_p10 = scmp.lt.s32.totalorder %s1705_s17, %s1889_s0 }
  0x2b   : > { %p1497_p9 = pnand %p1496_p7, %p1495_p5  ;;  %p1501_p2 = scmp.lt.s32.totalorder %s1499_s29, %s1494_s26 }
  0x2d   : > { %p1498_p12 = pneg %p1497_p9  ;;  %p1502_p13 = por %p1501_p2, %p1500_p10 }
  0x2f   : > { %p1503_p0 = pnand %p1502_p13, %p1498_p12 }
  0x31   : > { %1506 = shalt.err (!%p1503_p0)
}
  0x32   : > { %s1507_s7 = scalar_lea.vmem %s1711_s22, 4096  ;;  %s1595_s8 = smov [#allocation2]  }
  0x33   : > { %p1508_p1 = scmp.ne.s32.totalorder %s1711_s22, %s1507_s7  ;;  %s1512_s9 = sshll.u32 %s1595_s8, 4  ;;  %s1513_s9 = int_to_ptr.vmem [resolvable:$false] %s1512_s9 }
  0x34   : > { %s1514_s10 = scalar_lea.vmem %s1513_s9, 8192  ;;  %p1515_p9 = scmp.lt.s32.totalorder %s1711_s22, %s1513_s9 }
  0x35   : > { %p1510_p6 = pnand %p1508_p1, %p1496_p7  ;;  %p1516_p3 = scmp.lt.s32.totalorder %s1514_s10, %s1507_s7 }
  0x37   : > { %p1511_p5 = pneg %p1510_p6  ;;  %p1517_p4 = por %p1516_p3, %p1515_p9 }
  0x39   : > { %p1518_p8 = pnand %p1517_p4, %p1511_p5 }
  0x3b   : > { %1521 = shalt.err (!%p1518_p8)
}
  0x3c   : > { %s1596_s11 = smov 128   ;;  %s1597_s21 = smov 8  }
  0x3d   : > { %1356 = dma.hbm_to_vmem [thread:$0]  (!%p1707_p11), %s1705_s17, 4096, %s1711_s22, %s1713_s25, %s1596_s11, %s1596_s11, %s1597_s21  }
  0x3e   : > { %p1904_p1 = scmp.ne.s32.totalorder %s1899_s20, 0 }
  0x3f   : > { %s1737_s26 = sand.u32 (!%p1904_p1), 1, %s1582_s13   ;;  %p1905_p4 = scmp.ne.s32.totalorder (!%p1904_p1), %s1897_s18, 0 }
  0x40   : > { %172 = sbr.rel (%p1904_p1) target bundleno = 383 (0x17f), region = 32  ;;  %s994_s27 = sshll.u32 (!%p1904_p1), %s1737_s26, 8 }
  0x41   : > { %s175_s28 = scalar_lea.sflag (!%p1904_p1), [#allocation3], %s1737_s26  ;;  %s1741_s29 = scalar_lea.vmem (!%p1904_p1), [#allocation2], %s994_s27 }
  0x45   : > { %1565 = dma.done.wait (%p1905_p4), %s175_s28, 4096  }
  0x46   : > { %1567 = vsyncadd (%p1905_p4), %s175_s28, 4294963200  ;;  %p1906_p6 = scmp.eq.s32.totalorder %s1642_s16, 0 }
  0x48   : > { %1569 = dma.done.wait (%p1906_p6), [#allocation6], 2048   ;;  %p1907_p8 = pmov %p1906_p6 }
  0x49   : > { %v1404_v0 = vld [vmem:[#allocation5 + $0x78] sm:$0xff]   ;;  %v1406_v2 = vld [vmem:[#allocation5 + $0x70] sm:$0xff]   ;;  %v1408_v4 = vld [vmem:[#allocation5 + $0x68] sm:$0xff]   ;;  %s996_s17 = sshll.u32 %s1737_s26, 7  ;;  %s1117_s23 = sshll.u32 %s1642_s16, 11 }
  0x4a   : > { %1571 = vsyncadd (%p1907_p8), [#allocation6], 4294965248  ;;  %v1405_v1 = vld [vmem:[#allocation5 + $0x38] sm:$0xff]   ;;  %1213 = vmatprep.subr.bf16.mxu0 %v1404_v0  ;;  %1325 = vmatprep.subr.bf16.mxu1 %v1404_v0  ;;  %v1407_v3 = vld [vmem:[#allocation5 + $0x30] sm:$0xff]   ;;  %s1795_s22 = scalar_lea.vmem [#allocation7], %s996_s17  ;;  %s1842_s7 = scalar_lea.hbm %s1892_s3, %s1117_s23 }
  0x4b   : > { %1214 = vmatpush3.bf16.msra.mxu0 %v1405_v1  ;;  %1333 = vmatpush3.bf16.msra.mxu1 %v1405_v1  ;;  %v1409_v5 = vld [vmem:[#allocation5 + $0x28] sm:$0xff]   ;;  %v1410_v6 = vld [vmem:[#allocation5 + $0x60] sm:$0xff]   ;;  %v1412_v8 = vld [vmem:[#allocation5 + $0x58] sm:$0xff]   ;;  %s902_s25 = sshll.u32 %s1795_s22, 4  ;;  %s889_s16 = scalar_lea.sflag [#allocation4], %s1737_s26  ;;  %s1844_s25 = int_to_ptr.vmem [resolvable:$true] %s902_s25 }
  0x4c   : > { %1215 = vmatprep.subr.bf16.mxu0 %v1406_v2  ;;  %1326 = vmatprep.subr.bf16.mxu1 %v1406_v2  ;;  %v1411_v7 = vld [vmem:[#allocation5 + $0x20] sm:$0xff]   ;;  %v1413_v9 = vld [vmem:[#allocation5 + $0x18] sm:$0xff]   ;;  %v1414_v10 = vld [vmem:[#allocation5 + $0x50] sm:$0xff]   ;;  %s1522_s8 = scalar_lea.vmem %s1844_s25, 2048  ;;  %p1908_p11 = scmp.ne.s32.totalorder %s1902_s6, 0 }
  0x4d   : > { %v1422_v11 = vld [vmem:[%s1741_s29 + $0x4] ss:$8 sps:$4 sm:$0xff]   ;;  %v1415_v13 = vld [vmem:[#allocation5 + $0x10] sm:$0xff]   ;;  %v1420_v18 = vld [vmem:[%s1741_s29] ss:$8 sps:$4 sm:$0xff]   ;;  %p1523_p3 = scmp.ne.s32.totalorder %s1844_s25, %s1522_s8  ;;  %s1598_s9 = smov [#allocation7]  }
  0x4e   : > { %v1425_v12 = vld [vmem:[%s1741_s29 + $0x84] ss:$8 sps:$4 sm:$0xff]   ;;  %567 = vmatprep.mubr.bf16.mxu0 %v1422_v11  ;;  %v1423_v19 = vld [vmem:[%s1741_s29 + $0x80] ss:$8 sps:$4 sm:$0xff]   ;;  %v1426_v20 = vld [vmem:[%s1741_s29 + $0x14] ss:$8 sps:$4 sm:$0xff]  }
  0x4f   : > { %1216 = vmatpush3.bf16.msra.mxu0 %v1407_v3  ;;  %1334 = vmatpush3.bf16.msra.mxu1 %v1407_v3  ;;  %v1416_v14 = vld [vmem:[#allocation5 + $0x48] sm:$0xff]   ;;  %v1418_v16 = vld [vmem:[#allocation5 + $0x40] sm:$0xff]   ;;  %v1428_v21 = vld [vmem:[%s1741_s29 + $0x94] ss:$8 sps:$4 sm:$0xff]   ;;  %p1524_p7 = pnand %p1523_p3, %p1908_p11  ;;  %s1526_s10 = sshll.u32 %s1598_s9, 4  ;;  %s1527_s10 = int_to_ptr.vmem [resolvable:$false] %s1526_s10 }
  0x50   : > { %1217 = vmatprep.subr.bf16.mxu0 %v1408_v4  ;;  %1327 = vmatprep.subr.bf16.mxu1 %v1408_v4  ;;  %v1417_v15 = vld [vmem:[#allocation5 + $0x8] sm:$0xff]   ;;  %v1419_v17 = vld [vmem:[#allocation5] sm:$0xff]   ;;  %v1430_v22 = vld [vmem:[%s1741_s29 + $0x10] ss:$8 sps:$4 sm:$0xff]   ;;  %s1528_s11 = scalar_lea.vmem %s1527_s10, 4096  ;;  %p1529_p10 = scmp.lt.s32.totalorder %s1844_s25, %s1527_s10 }
  0x51   : > { %631 = vmatprep.mubr.bf16.mxu1 %v1425_v12  ;;  %v1431_v23 = vld [vmem:[%s1741_s29 + $0x90] ss:$8 sps:$4 sm:$0xff]   ;;  %v1432_v24 = vld [vmem:[%s1741_s29 + $0x24] ss:$8 sps:$4 sm:$0xff]   ;;  %v1436_v26 = vld [vmem:[%s1741_s29 + $0x20] ss:$8 sps:$4 sm:$0xff]   ;;  %p1525_p12 = pneg %p1524_p7  ;;  %p1530_p2 = scmp.lt.s32.totalorder %s1528_s11, %s1522_s8 }
  0x52   : > { %v1434_v25 = vld [vmem:[%s1741_s29 + $0xa4] ss:$8 sps:$4 sm:$0xff]   ;;  %v1437_v27 = vld [vmem:[%s1741_s29 + $0xa0] ss:$8 sps:$4 sm:$0xff]   ;;  %v1438_v28 = vld [vmem:[%s1741_s29 + $0x34] ss:$8 sps:$4 sm:$0xff]  }
  0x53   : > { %1218 = vmatpush3.bf16.msra.mxu0 %v1409_v5  ;;  %1335 = vmatpush3.bf16.msra.mxu1 %v1409_v5  ;;  %v1440_v29 = vld [vmem:[%s1741_s29 + $0xb4] ss:$8 sps:$4 sm:$0xff]   ;;  %v1442_v30 = vld [vmem:[%s1741_s29 + $0x30] ss:$8 sps:$4 sm:$0xff]   ;;  %v1444_v32 = vld [vmem:[%s1741_s29 + $0x44] ss:$8 sps:$4 sm:$0xff]   ;;  %p1531_p13 = por %p1530_p2, %p1529_p10 }
  0x54   : > { %1219 = vmatprep.subr.bf16.mxu0 %v1410_v6  ;;  %1328 = vmatprep.subr.bf16.mxu1 %v1410_v6  ;;  %v1443_v31 = vld [vmem:[%s1741_s29 + $0xb0] ss:$8 sps:$4 sm:$0xff]   ;;  %v1446_v33 = vld [vmem:[%s1741_s29 + $0xc4] ss:$8 sps:$4 sm:$0xff]   ;;  %v1448_v34 = vld [vmem:[%s1741_s29 + $0x40] ss:$8 sps:$4 sm:$0xff]  }
  0x55   : > { %v1449_v35 = vld [vmem:[%s1741_s29 + $0xc0] ss:$8 sps:$4 sm:$0xff]   ;;  %v1450_v36 = vld [vmem:[%s1741_s29 + $0x54] ss:$8 sps:$4 sm:$0xff]   ;;  %v1454_v38 = vld [vmem:[%s1741_s29 + $0x50] ss:$8 sps:$4 sm:$0xff]   ;;  %p1532_p0 = pnand %p1531_p13, %p1525_p12 }
  0x56   : > { %v1452_v37 = vld [vmem:[%s1741_s29 + $0xd4] ss:$8 sps:$4 sm:$0xff]   ;;  %v1455_v39 = vld [vmem:[%s1741_s29 + $0xd0] ss:$8 sps:$4 sm:$0xff]   ;;  %v1456_v40 = vld [vmem:[%s1741_s29 + $0x64] ss:$8 sps:$4 sm:$0xff]  }
  0x57   : > { %1220 = vmatpush3.bf16.msra.mxu0 %v1411_v7  ;;  %1336 = vmatpush3.bf16.msra.mxu1 %v1411_v7  ;;  %v1458_v41 = vld [vmem:[%s1741_s29 + $0xe4] ss:$8 sps:$4 sm:$0xff]   ;;  %v1460_v42 = vld [vmem:[%s1741_s29 + $0x60] ss:$8 sps:$4 sm:$0xff]   ;;  %v1462_v44 = vld [vmem:[%s1741_s29 + $0x74] ss:$8 sps:$4 sm:$0xff]  }
  0x58   : > { %1221 = vmatprep.subr.bf16.mxu0 %v1412_v8  ;;  %1329 = vmatprep.subr.bf16.mxu1 %v1412_v8  ;;  %v1461_v43 = vld [vmem:[%s1741_s29 + $0xe0] ss:$8 sps:$4 sm:$0xff]   ;;  %v1464_v45 = vld [vmem:[%s1741_s29 + $0xf4] ss:$8 sps:$4 sm:$0xff]   ;;  %v1466_v46 = vld [vmem:[%s1741_s29 + $0x70] ss:$8 sps:$4 sm:$0xff]  }
  0x59   : > { %v1467_v47 = vld [vmem:[%s1741_s29 + $0xf0] ss:$8 sps:$4 sm:$0xff]   ;;  %v1786_v52 = vld [vmem:[%s1891_s2] ss:$0 sm:$0xff] }
  0x5b   : > { %1222 = vmatpush3.bf16.msra.mxu0 %v1413_v9  ;;  %1337 = vmatpush3.bf16.msra.mxu1 %v1413_v9 }
  0x5c   : > { %1223 = vmatprep.subr.bf16.mxu0 %v1414_v10  ;;  %1330 = vmatprep.subr.bf16.mxu1 %v1414_v10 }
  0x5f   : > { %1224 = vmatpush3.bf16.msra.mxu0 %v1415_v13  ;;  %1338 = vmatpush3.bf16.msra.mxu1 %v1415_v13 }
  0x60   : > { %1225 = vmatprep.subr.bf16.mxu0 %v1416_v14  ;;  %1331 = vmatprep.subr.bf16.mxu1 %v1416_v14 }
  0x63   : > { %1226 = vmatpush3.bf16.msra.mxu0 %v1417_v15  ;;  %1339 = vmatpush3.bf16.msra.mxu1 %v1417_v15 }
  0x64   : > { %1227 = vmatprep.subr.bf16.mxu0 %v1418_v16  ;;  %1332 = vmatprep.subr.bf16.mxu1 %v1418_v16 }
  0x67   : > { %1228 = vmatpush3.bf16.msra.mxu0 %v1419_v17  ;;  %1340 = vmatpush3.bf16.msra.mxu1 %v1419_v17 }
  0x6a   : > { %568 = vmatmul.mubr.bf16.vlgmr.msra.gmra.mxu0 %v1420_v18  ;;  %632 = vmatmul.mubr.bf16.vlgmr.msra.gmra.mxu1 %v1423_v19 }
  0x6b   : > { %575 = vmatprep.mubr.bf16.mxu0 %v1426_v20  ;;  %639 = vmatprep.mubr.bf16.mxu1 %v1428_v21 }
  0x72   : > { %576 = vmatmul.mubr.bf16.gmra.mxu0 %v1430_v22  ;;  %640 = vmatmul.mubr.bf16.gmra.mxu1 %v1431_v23 }
  0x73   : > { %583 = vmatprep.mubr.bf16.mxu0 %v1432_v24  ;;  %647 = vmatprep.mubr.bf16.mxu1 %v1434_v25 }
  0x7a   : > { %584 = vmatmul.mubr.bf16.gmra.mxu0 %v1436_v26  ;;  %648 = vmatmul.mubr.bf16.gmra.mxu1 %v1437_v27 }
  0x7b   : > { %591 = vmatprep.mubr.bf16.mxu0 %v1438_v28  ;;  %655 = vmatprep.mubr.bf16.mxu1 %v1440_v29 }
  0x82   : > { %592 = vmatmul.mubr.bf16.gmra.mxu0 %v1442_v30  ;;  %656 = vmatmul.mubr.bf16.gmra.mxu1 %v1443_v31 }
  0x83   : > { %599 = vmatprep.mubr.bf16.mxu0 %v1444_v32  ;;  %663 = vmatprep.mubr.bf16.mxu1 %v1446_v33 }
  0x8a   : > { %600 = vmatmul.mubr.bf16.gmra.mxu0 %v1448_v34  ;;  %664 = vmatmul.mubr.bf16.gmra.mxu1 %v1449_v35 }
  0x8b   : > { %607 = vmatprep.mubr.bf16.mxu0 %v1450_v36  ;;  %671 = vmatprep.mubr.bf16.mxu1 %v1452_v37 }
  0x92   : > { %608 = vmatmul.mubr.bf16.gmra.mxu0 %v1454_v38  ;;  %672 = vmatmul.mubr.bf16.gmra.mxu1 %v1455_v39 }
  0x93   : > { %615 = vmatprep.mubr.bf16.mxu0 %v1456_v40  ;;  %679 = vmatprep.mubr.bf16.mxu1 %v1458_v41 }
  0x9a   : > { %616 = vmatmul.mubr.bf16.gmra.mxu0 %v1460_v42  ;;  %680 = vmatmul.mubr.bf16.gmra.mxu1 %v1461_v43 }
  0x9b   : > { %623 = vmatprep.mubr.bf16.mxu0 %v1462_v44  ;;  %687 = vmatprep.mubr.bf16.mxu1 %v1464_v45 }
  0xa2   : > { %624 = vmatmul.mubr.bf16.gmra.mxu0 %v1466_v46  ;;  %688 = vmatmul.mubr.bf16.gmra.mxu1 %v1467_v47 }
 0x12a   : > { %v1229_v48 = vpop.f32.mrf.mxu0  ;;  %v1277_v49 = vpop.f32.mrf.mxu1 }
 0x12c   : > { %v1230_v50 = vpop.f32.mrf.mxu0  ;;  %v1278_v51 = vpop.f32.mrf.mxu1 }
 0x12d   : > { %v1231_v53 = vadd.f32 %v1230_v50, %v1229_v48  ;;  %v1279_v54 = vadd.f32 %v1278_v51, %v1277_v49 }
 0x12e   : > { %v1232_v55 = vpop.f32.mrf.mxu0  ;;  %v1280_v56 = vpop.f32.mrf.mxu1 }
 0x12f   : > { %v570_v57 = vadd.f32 %v1231_v53, %v1786_v52  ;;  %v634_v58 = vadd.f32 %v1279_v54, %v1786_v52 }
 0x130   : > { %v1233_v59 = vpop.f32.mrf.mxu0  ;;  %v1281_v60 = vpop.f32.mrf.mxu1 }
 0x131   : > { %v1234_v61 = vadd.f32 %v1233_v59, %v1232_v55  ;;  %v1282_v62 = vadd.f32 %v1281_v60, %v1280_v56  ;;  %v696_v3 = vmax.f32 %v570_v57, 0.0  ;;  %v712_v4 = vmax.f32 %v634_v58, 0.0 }
 0x132   : > { %v1235_v63 = vpop.f32.mrf.mxu0  ;;  %v1283_v0 = vpop.f32.mrf.mxu1 }
 0x133   : > { %v573_v1 = vadd.f32 %v1234_v61, %v1786_v52  ;;  %v637_v2 = vadd.f32 %v1282_v62, %v1786_v52 }
 0x134   : > { %v1236_v5 = vpop.f32.mrf.mxu0  ;;  %v1284_v6 = vpop.f32.mrf.mxu1 }
 0x135   : > { %v697_v7 = vmax.f32 %v573_v1, 0.0  ;;  %v713_v8 = vmax.f32 %v637_v2, 0.0  ;;  %v1237_v9 = vadd.f32 %v1236_v5, %v1235_v63  ;;  %v1285_v10 = vadd.f32 %v1284_v6, %v1283_v0 }
 0x136   : > { %v1238_v11 = vpop.f32.mrf.mxu0  ;;  %v1286_v12 = vpop.f32.mrf.mxu1 }
 0x137   : > { %v1121_v13 = vpack.c.bf16 %v697_v7, %v696_v3  ;;  %v1161_v14 = vpack.c.bf16 %v713_v8, %v712_v4  ;;  %v578_v15 = vadd.f32 %v1237_v9, %v1786_v52  ;;  %v642_v16 = vadd.f32 %v1285_v10, %v1786_v52 }
 0x138   : > { %v1239_v17 = vpop.f32.mrf.mxu0  ;;  %v1287_v18 = vpop.f32.mrf.mxu1 }
 0x139   : > { %1122 = vst [vmem:[%s1795_s22] sm:$0xff] %v1121_v13   ;;  %1205 = vst [vmem:[%s1795_s22 + $0x40] sm:$0xff] %v1161_v14   ;;  %v1240_v19 = vadd.f32 %v1239_v17, %v1238_v11  ;;  %v1288_v20 = vadd.f32 %v1287_v18, %v1286_v12  ;;  %v698_v25 = vmax.f32 %v578_v15, 0.0  ;;  %v714_v26 = vmax.f32 %v642_v16, 0.0 }
 0x13a   : > { %v1241_v21 = vpop.f32.mrf.mxu0  ;;  %v1289_v22 = vpop.f32.mrf.mxu1 }
 0x13b   : > { %v581_v23 = vadd.f32 %v1240_v19, %v1786_v52  ;;  %v645_v24 = vadd.f32 %v1288_v20, %v1786_v52 }
 0x13c   : > { %v1242_v27 = vpop.f32.mrf.mxu0  ;;  %v1290_v28 = vpop.f32.mrf.mxu1 }
 0x13d   : > { %v699_v29 = vmax.f32 %v581_v23, 0.0  ;;  %v715_v30 = vmax.f32 %v645_v24, 0.0  ;;  %v1243_v31 = vadd.f32 %v1242_v27, %v1241_v21  ;;  %v1291_v32 = vadd.f32 %v1290_v28, %v1289_v22 }
 0x13e   : > { %v1244_v33 = vpop.f32.mrf.mxu0  ;;  %v1292_v34 = vpop.f32.mrf.mxu1 }
 0x13f   : > { %v1126_v35 = vpack.c.bf16 %v699_v29, %v698_v25  ;;  %v1166_v36 = vpack.c.bf16 %v715_v30, %v714_v26  ;;  %v586_v37 = vadd.f32 %v1243_v31, %v1786_v52  ;;  %v650_v38 = vadd.f32 %v1291_v32, %v1786_v52 }
 0x140   : > { %v1245_v39 = vpop.f32.mrf.mxu0  ;;  %v1293_v40 = vpop.f32.mrf.mxu1 }
 0x141   : > { %1198 = vst [vmem:[%s1795_s22 + $0x8] sm:$0xff] %v1126_v35   ;;  %1206 = vst [vmem:[%s1795_s22 + $0x48] sm:$0xff] %v1166_v36   ;;  %v1246_v41 = vadd.f32 %v1245_v39, %v1244_v33  ;;  %v1294_v42 = vadd.f32 %v1293_v40, %v1292_v34  ;;  %v700_v47 = vmax.f32 %v586_v37, 0.0  ;;  %v716_v48 = vmax.f32 %v650_v38, 0.0 }
 0x142   : > { %v1247_v43 = vpop.f32.mrf.mxu0  ;;  %v1295_v44 = vpop.f32.mrf.mxu1 }
 0x143   : > { %v589_v45 = vadd.f32 %v1246_v41, %v1786_v52  ;;  %v653_v46 = vadd.f32 %v1294_v42, %v1786_v52 }
 0x144   : > { %v1248_v49 = vpop.f32.mrf.mxu0  ;;  %v1296_v50 = vpop.f32.mrf.mxu1 }
 0x145   : > { %v701_v51 = vmax.f32 %v589_v45, 0.0  ;;  %v717_v53 = vmax.f32 %v653_v46, 0.0  ;;  %v1249_v54 = vadd.f32 %v1248_v49, %v1247_v43  ;;  %v1297_v55 = vadd.f32 %v1296_v50, %v1295_v44 }
 0x146   : > { %v1250_v56 = vpop.f32.mrf.mxu0  ;;  %v1298_v57 = vpop.f32.mrf.mxu1 }
 0x147   : > { %v1131_v58 = vpack.c.bf16 %v701_v51, %v700_v47  ;;  %v1171_v59 = vpack.c.bf16 %v717_v53, %v716_v48  ;;  %v594_v60 = vadd.f32 %v1249_v54, %v1786_v52  ;;  %v658_v61 = vadd.f32 %v1297_v55, %v1786_v52 }
 0x148   : > { %v1251_v62 = vpop.f32.mrf.mxu0  ;;  %v1299_v63 = vpop.f32.mrf.mxu1 }
 0x149   : > { %1199 = vst [vmem:[%s1795_s22 + $0x10] sm:$0xff] %v1131_v58   ;;  %1207 = vst [vmem:[%s1795_s22 + $0x50] sm:$0xff] %v1171_v59   ;;  %v1252_v0 = vadd.f32 %v1251_v62, %v1250_v56  ;;  %v1300_v1 = vadd.f32 %v1299_v63, %v1298_v57  ;;  %v702_v6 = vmax.f32 %v594_v60, 0.0  ;;  %v718_v7 = vmax.f32 %v658_v61, 0.0 }
 0x14a   : > { %v1253_v2 = vpop.f32.mrf.mxu0  ;;  %v1301_v3 = vpop.f32.mrf.mxu1 }
 0x14b   : > { %v597_v4 = vadd.f32 %v1252_v0, %v1786_v52  ;;  %v661_v5 = vadd.f32 %v1300_v1, %v1786_v52 }
 0x14c   : > { %v1254_v8 = vpop.f32.mrf.mxu0  ;;  %v1302_v9 = vpop.f32.mrf.mxu1 }
 0x14d   : > { %v703_v10 = vmax.f32 %v597_v4, 0.0  ;;  %v719_v11 = vmax.f32 %v661_v5, 0.0  ;;  %v1255_v12 = vadd.f32 %v1254_v8, %v1253_v2  ;;  %v1303_v13 = vadd.f32 %v1302_v9, %v1301_v3 }
 0x14e   : > { %v1256_v14 = vpop.f32.mrf.mxu0  ;;  %v1304_v15 = vpop.f32.mrf.mxu1 }
 0x14f   : > { %v1136_v16 = vpack.c.bf16 %v703_v10, %v702_v6  ;;  %v1176_v17 = vpack.c.bf16 %v719_v11, %v718_v7  ;;  %v602_v18 = vadd.f32 %v1255_v12, %v1786_v52  ;;  %v666_v19 = vadd.f32 %v1303_v13, %v1786_v52 }
 0x150   : > { %v1257_v20 = vpop.f32.mrf.mxu0  ;;  %v1305_v21 = vpop.f32.mrf.mxu1 }
 0x151   : > { %1200 = vst [vmem:[%s1795_s22 + $0x18] sm:$0xff] %v1136_v16   ;;  %1208 = vst [vmem:[%s1795_s22 + $0x58] sm:$0xff] %v1176_v17   ;;  %v1258_v22 = vadd.f32 %v1257_v20, %v1256_v14  ;;  %v1306_v23 = vadd.f32 %v1305_v21, %v1304_v15  ;;  %v704_v28 = vmax.f32 %v602_v18, 0.0  ;;  %v720_v29 = vmax.f32 %v666_v19, 0.0 }
 0x152   : > { %v1259_v24 = vpop.f32.mrf.mxu0  ;;  %v1307_v25 = vpop.f32.mrf.mxu1 }
 0x153   : > { %v605_v26 = vadd.f32 %v1258_v22, %v1786_v52  ;;  %v669_v27 = vadd.f32 %v1306_v23, %v1786_v52 }
 0x154   : > { %v1260_v30 = vpop.f32.mrf.mxu0  ;;  %v1308_v31 = vpop.f32.mrf.mxu1 }
 0x155   : > { %v705_v32 = vmax.f32 %v605_v26, 0.0  ;;  %v721_v33 = vmax.f32 %v669_v27, 0.0  ;;  %v1261_v34 = vadd.f32 %v1260_v30, %v1259_v24  ;;  %v1309_v35 = vadd.f32 %v1308_v31, %v1307_v25 }
 0x156   : > { %v1262_v36 = vpop.f32.mrf.mxu0  ;;  %v1310_v37 = vpop.f32.mrf.mxu1 }
 0x157   : > { %v1141_v38 = vpack.c.bf16 %v705_v32, %v704_v28  ;;  %v1181_v39 = vpack.c.bf16 %v721_v33, %v720_v29  ;;  %v610_v40 = vadd.f32 %v1261_v34, %v1786_v52  ;;  %v674_v41 = vadd.f32 %v1309_v35, %v1786_v52 }
 0x158   : > { %v1263_v42 = vpop.f32.mrf.mxu0  ;;  %v1311_v43 = vpop.f32.mrf.mxu1 }
 0x159   : > { %1201 = vst [vmem:[%s1795_s22 + $0x20] sm:$0xff] %v1141_v38   ;;  %1209 = vst [vmem:[%s1795_s22 + $0x60] sm:$0xff] %v1181_v39   ;;  %v1264_v44 = vadd.f32 %v1263_v42, %v1262_v36  ;;  %v1312_v45 = vadd.f32 %v1311_v43, %v1310_v37  ;;  %v706_v50 = vmax.f32 %v610_v40, 0.0  ;;  %v722_v51 = vmax.f32 %v674_v41, 0.0 }
 0x15a   : > { %v1265_v46 = vpop.f32.mrf.mxu0  ;;  %v1313_v47 = vpop.f32.mrf.mxu1 }
 0x15b   : > { %v613_v48 = vadd.f32 %v1264_v44, %v1786_v52  ;;  %v677_v49 = vadd.f32 %v1312_v45, %v1786_v52 }
 0x15c   : > { %v1266_v53 = vpop.f32.mrf.mxu0  ;;  %v1314_v54 = vpop.f32.mrf.mxu1 }
 0x15d   : > { %v707_v55 = vmax.f32 %v613_v48, 0.0  ;;  %v723_v56 = vmax.f32 %v677_v49, 0.0  ;;  %v1267_v57 = vadd.f32 %v1266_v53, %v1265_v46  ;;  %v1315_v58 = vadd.f32 %v1314_v54, %v1313_v47 }
 0x15e   : > { %v1268_v59 = vpop.f32.mrf.mxu0  ;;  %v1316_v60 = vpop.f32.mrf.mxu1 }
 0x15f   : > { %v1146_v61 = vpack.c.bf16 %v707_v55, %v706_v50  ;;  %v1186_v62 = vpack.c.bf16 %v723_v56, %v722_v51  ;;  %v618_v63 = vadd.f32 %v1267_v57, %v1786_v52  ;;  %v682_v0 = vadd.f32 %v1315_v58, %v1786_v52 }
 0x160   : > { %v1269_v1 = vpop.f32.mrf.mxu0  ;;  %v1317_v2 = vpop.f32.mrf.mxu1 }
 0x161   : > { %1202 = vst [vmem:[%s1795_s22 + $0x28] sm:$0xff] %v1146_v61   ;;  %1210 = vst [vmem:[%s1795_s22 + $0x68] sm:$0xff] %v1186_v62   ;;  %v1270_v3 = vadd.f32 %v1269_v1, %v1268_v59  ;;  %v1318_v4 = vadd.f32 %v1317_v2, %v1316_v60  ;;  %v708_v9 = vmax.f32 %v618_v63, 0.0  ;;  %v724_v10 = vmax.f32 %v682_v0, 0.0 }
 0x162   : > { %v1271_v5 = vpop.f32.mrf.mxu0  ;;  %v1319_v6 = vpop.f32.mrf.mxu1 }
 0x163   : > { %v621_v7 = vadd.f32 %v1270_v3, %v1786_v52  ;;  %v685_v8 = vadd.f32 %v1318_v4, %v1786_v52 }
 0x164   : > { %v1272_v11 = vpop.f32.mrf.mxu0  ;;  %v1320_v12 = vpop.f32.mrf.mxu1 }
 0x165   : > { %v709_v13 = vmax.f32 %v621_v7, 0.0  ;;  %v725_v14 = vmax.f32 %v685_v8, 0.0  ;;  %v1273_v15 = vadd.f32 %v1272_v11, %v1271_v5  ;;  %v1321_v16 = vadd.f32 %v1320_v12, %v1319_v6 }
 0x166   : > { %v1274_v17 = vpop.f32.mrf.mxu0  ;;  %v1322_v18 = vpop.f32.mrf.mxu1 }
 0x167   : > { %v1151_v19 = vpack.c.bf16 %v709_v13, %v708_v9  ;;  %v1191_v20 = vpack.c.bf16 %v725_v14, %v724_v10  ;;  %v626_v23 = vadd.f32 %v1273_v15, %v1786_v52  ;;  %v690_v24 = vadd.f32 %v1321_v16, %v1786_v52 }
 0x168   : > { %v1275_v21 = vpop.f32.mrf.mxu0  ;;  %v1323_v22 = vpop.f32.mrf.mxu1 }
 0x169   : > { %1203 = vst [vmem:[%s1795_s22 + $0x30] sm:$0xff] %v1151_v19   ;;  %1211 = vst [vmem:[%s1795_s22 + $0x70] sm:$0xff] %v1191_v20   ;;  %v1276_v25 = vadd.f32 %v1275_v21, %v1274_v17  ;;  %v1324_v26 = vadd.f32 %v1323_v22, %v1322_v18  ;;  %v710_v29 = vmax.f32 %v626_v23, 0.0  ;;  %v726_v30 = vmax.f32 %v690_v24, 0.0 }
 0x16b   : > { %v629_v27 = vadd.f32 %v1276_v25, %v1786_v52  ;;  %v693_v28 = vadd.f32 %v1324_v26, %v1786_v52 }
 0x16d   : > { %v711_v31 = vmax.f32 %v629_v27, 0.0  ;;  %v727_v32 = vmax.f32 %v693_v28, 0.0 }
 0x16f   : > { %v1156_v33 = vpack.c.bf16 %v711_v31, %v710_v29  ;;  %v1196_v34 = vpack.c.bf16 %v727_v32, %v726_v30 }
 0x171   : > { %1204 = vst [vmem:[%s1795_s22 + $0x38] sm:$0xff] %v1156_v33   ;;  %1212 = vst [vmem:[%s1795_s22 + $0x78] sm:$0xff] %v1196_v34  }
 0x172   : > { %1535 = shalt.err (!%p1532_p0)
}
 0x173   : > { %s1536_s21 = scalar_lea.hbm %s1842_s7, 2048  ;;  %s1540_s29 = scalar_lea.hbm %s1892_s3, 4096 }
 0x174   : > { %p1537_p5 = scmp.ne.s32.totalorder %s1842_s7, %s1536_s21  ;;  %p1541_p4 = scmp.lt.s32.totalorder %s1842_s7, %s1892_s3 }
 0x175   : > { %p1542_p6 = scmp.lt.s32.totalorder %s1540_s29, %s1536_s21 }
 0x176   : > { %p1538_p9 = pnand %p1537_p5, %p1908_p11 }
 0x177   : > { %p1543_p8 = por %p1542_p6, %p1541_p4 }
 0x178   : > { %p1539_p1 = pneg %p1538_p9 }
 0x17a   : > { %p1544_p3 = pnand %p1543_p8, %p1539_p1 }
 0x17c   : > { %1547 = shalt.err (!%p1544_p3)
}
 0x17d   : > { %s1599_s17 = smov 64   ;;  %s1600_s22 = smov 4  }
 0x17e   : > { %1347 = dma.vmem_to_hbm [thread:$0]  (%p1908_p11), %s1844_s25, 2048, %s1842_s7, %s889_s16, %s1599_s17, %s1599_s17, %s1600_s22  }
 0x17f PF: > { %s917_s23 = sand.u32 1, %s1578_s12   ;;  %p1909_p7 = scmp.ne.s32.totalorder %s1898_s19, 0 }
 0x180   : > { %p1910_p12 = scmp.ge.s32.totalorder %s1590_s15, 2  ;;  %s918_s30 = scalar_lea.sflag [#allocation4], %s917_s23 }
 0x182   : > { %p1358_p10 = pnand %p1910_p12, %p1909_p7 }
 0x184   : > { %p1359_p2 = pneg %p1358_p10 }
 0x186   : > { %1573 = dma.done.wait (%p1359_p2), %s918_s30, 2048  }
 0x187   : > { %1575 = vsyncadd (%p1359_p2), %s918_s30, 4294965248  ;;  %p17_p13 = scmp.ge.s32.totalorder %s1675_s24, 4   ;;  %s1911_s12 = smov %s1582_s13 }
 0x188   : > { %s1912_s13 = smov %s1586_s14  ;;  %s1913_s14 = smov %s1692_s5 }
 0x189   : > { %s1914_s15 = smov %s1675_s24  ;;  %19 = sbr.rel (!%p17_p13) target bundleno = 6 (0x6), region = 81 }
 0x18e   :  { %923 = vsyncpa [#allocation3], 1 }
 0x18f   :  { %925 = vsyncpa [#allocation3 + $0x1], 1 }
 0x190   :  { %926 = vsyncpa [#allocation6], 1 }
 0x191   :  { %927 = vsyncpa [#allocation4], 1 }
 0x192   :  { %929 = vsyncpa [#allocation4 + $0x1], 1 }

</bundles_post_ra>
